<compile_context>
chip_gen: v5e
topology: v5e:2x2
jax: 0.10.0
libtpu: 0.0.40
codegen_flags: <defaults>
</compile_context>

<pallas_src>
import functools

import jax
import jax.numpy as jnp
from jax import lax
from jax.experimental import pallas as pl
from jax.experimental.pallas import tpu as pltpu


def _ceil_to(x, m):
    return (x + m - 1) // m * m


def _project(k_ref, e_ref, pts_ref, bv, H, W):
    """Camera projection shared by both sampling paths.

    Returns (ix, iy, valid, zc), each (1, TN):
      ix, iy : continuous pixel coords (grid_sample, align_corners=False)
      valid  : FeatureFetcher valid mask (|gx|<1.00001 & |gy|<1.00001)
      zc     : camera-space depth
    """
    P = pts_ref[0]                         # (3, TN) world points
    px = P[0:1, :]
    py = P[1:2, :]
    pz = P[2:3, :]

    def e(r, c):                           # scalar reads from 1-D SMEM
        return e_ref[bv * 12 + r * 4 + c]

    def k(r, c):
        return k_ref[bv * 9 + r * 3 + c]

    # p_cam = R @ p_world + t
    xc = e(0, 0) * px + e(0, 1) * py + e(0, 2) * pz + e(0, 3)
    yc = e(1, 0) * px + e(1, 1) * py + e(1, 2) * pz + e(1, 3)
    zc = e(2, 0) * px + e(2, 1) * py + e(2, 2) * pz + e(2, 3)

    # perspective divide: one exact reciprocal (EUP), two multiplies
    rz = pl.reciprocal(zc)
    un = xc * rz
    vn = yc * rz

    # uv = K @ [u, v, 1]   (only rows 0 and 1 are used downstream)
    ux = k(0, 0) * un + k(0, 1) * vn + k(0, 2)
    uy = k(1, 0) * un + k(1, 1) * vn + k(1, 2)

    # normalized sampling grid (same formulas/order as the PyTorch code)
    gx = (ux - 0.5) / float(W - 1) * 2.0 - 1.0
    gy = (uy - 0.5) / float(H - 1) * 2.0 - 1.0

    valid = jnp.where((jnp.abs(gx) < 1.00001) & (jnp.abs(gy) < 1.00001),
                      1.0, 0.0)

    gx = jnp.where(jnp.isnan(gx), 100.0, gx)
    gy = jnp.where(jnp.isnan(gy), 100.0, gy)

    # F.grid_sample continuous pixel coordinates (align_corners=False)
    ix = ((gx + 1.0) * W - 1.0) * 0.5
    iy = ((gy + 1.0) * H - 1.0) * 0.5
    return ix, iy, valid, zc


def _fused_kernel(k_ref, e_ref, pts_ref, fmap_ref, feat_ref, mz_ref,
                  *, H, W, Wp, V):
    """Small-map path: one MXU matmul (C, H*Wp) @ (H*Wp, TN)."""
    b = pl.program_id(0)
    v = pl.program_id(1)
    bv = b * V + v
    TN = pts_ref.shape[2]

    ix, iy, valid, zc = _project(k_ref, e_ref, pts_ref, bv, H, W)

    # tent weights; taps outside the image (incl. the W->Wp zero-pad columns)
    # either get weight 0 or multiply zero-padded features -> exact
    # zero-padding grid_sample semantics.
    w_idx = lax.broadcasted_iota(jnp.int32, (Wp, TN), 0).astype(jnp.float32)
    h_idx = lax.broadcasted_iota(jnp.int32, (H, TN), 0).astype(jnp.float32)
    wx_mat = jnp.maximum(1.0 - jnp.abs(ix - w_idx), 0.0)      # (Wp, TN)
    wy_mat = jnp.maximum(1.0 - jnp.abs(iy - h_idx), 0.0)      # (H, TN)

    # dense bilinear weight: one VPU multiply per (h, w, n) entry;
    # the reshape is a free re-view because Wp % 8 == 0.
    weight = (wy_mat[:, None, :] * wx_mat[None, :, :]).reshape(H * Wp, TN)

    feat = jnp.dot(fmap_ref[0], weight,
                   preferred_element_type=jnp.float32)        # (C, TN)
    feat_ref[0] = feat.astype(feat_ref.dtype)
    mz_ref[0] = jnp.concatenate([valid, zc], axis=0)          # (2, TN)


def _separable_kernel(k_ref, e_ref, pts_ref, fmap_ref, feat_ref, mz_ref,
                      *, C, H, W, Hp, V):
    """Large-map path: MXU contraction over W, then row-weighted reduce."""
    b = pl.program_id(0)
    v = pl.program_id(1)
    bv = b * V + v
    TN = pts_ref.shape[2]

    ix, iy, valid, zc = _project(k_ref, e_ref, pts_ref, bv, H, W)

    w_idx = lax.broadcasted_iota(jnp.int32, (W, TN), 0).astype(jnp.float32)
    h_idx = lax.broadcasted_iota(jnp.int32, (Hp, TN), 0).astype(jnp.float32)
    wx_mat = jnp.maximum(1.0 - jnp.abs(ix - w_idx), 0.0)      # (W, TN)
    wy_mat = jnp.maximum(1.0 - jnp.abs(iy - h_idx), 0.0)      # (Hp, TN)

    # stage 1 (MXU): contract over W -> per-image-row partial features
    t = jnp.dot(fmap_ref[0], wx_mat,
                preferred_element_type=jnp.float32)           # (C*Hp, TN)
    # stage 2 (VPU + sublane reduce); reshape is free since Hp % 8 == 0
    feat = jnp.sum(t.reshape(C, Hp, TN) * wy_mat[None, :, :], axis=1)

    feat_ref[0] = feat.astype(feat_ref.dtype)
    mz_ref[0] = jnp.concatenate([valid, zc], axis=0)          # (2, TN)


def feature_fetcher(feature_maps, pts, cam_intrinsics, cam_extrinsics,
                    *, force_separable=False):
    """Pallas equivalent of FeatureFetcher.forward (mode='bilinear').

    feature_maps:   [B, V, C, H, W]
    pts:            [B, 3, N]
    cam_intrinsics: [B, V, 3, 3]
    cam_extrinsics: [B, V, 3, 4]
    returns (pts_feature [B,V,C,N], valid_mask [B,V,1,N], z [B,V,1,N])
    """
    # TODO(synk): the cam_extrinsics=None branch of the PyTorch module is not
    # implemented (extrinsics are required here).
    B, V, C, H, W = feature_maps.shape
    N = pts.shape[2]
    BV = B * V

    # --- N tiling: lane-dense TN, pad N instead of a "whole-N" fallback ----
    TN = 128 if N <= 128 else 256         # 256 fills v6e/v7x MXU, OK on v5e
    Np = _ceil_to(N, TN)
    nt = Np // TN

    pts_f = pts.astype(jnp.float32)
    if Np != N:
        pts_f = jnp.pad(pts_f, ((0, 0), (0, 0), (0, Np - N)))

    # --- camera tables: flat 1-D SMEM (no 2-D SMEM row padding) ------------
    k_flat = cam_intrinsics.astype(jnp.float32).reshape(BV * 9)
    e_flat = cam_extrinsics.astype(jnp.float32).reshape(BV * 12)

    # --- feature-map layout / path choice ----------------------------------
    fm = feature_maps.astype(jnp.float32)
    Wp = _ceil_to(W, 8)
    fused = (not force_separable) and (H * Wp <= 2048)

    if fused:
        if Wp != W:          # zero-pad W; padded taps contribute exactly 0
            fm = jnp.pad(fm, ((0, 0), (0, 0), (0, 0), (0, 0), (0, Wp - W)))
        fmap = fm.reshape(BV, C, H * Wp)                  # lane dim = H*Wp
        kernel = functools.partial(_fused_kernel, H=H, W=W, Wp=Wp, V=V)
        fmap_spec = pl.BlockSpec((1, C, H * Wp),
                                 lambda b, v, n: (b * V + v, 0, 0))
        Hp = H
    else:
        Hp = _ceil_to(H, 8)
        if Hp != H:          # zero-pad H; padded rows contribute exactly 0
            fm = jnp.pad(fm, ((0, 0), (0, 0), (0, 0), (0, Hp - H), (0, 0)))
        fmap = fm.reshape(BV, C * Hp, W)
        kernel = functools.partial(_separable_kernel, C=C, H=H, W=W, Hp=Hp,
                                   V=V)
        fmap_spec = pl.BlockSpec((1, C * Hp, W),
                                 lambda b, v, n: (b * V + v, 0, 0))

    # --- explicit VMEM budget (blocks are double-buffered) -----------------
    def _vtile(r, c):
        return _ceil_to(max(r, 1), 8) * _ceil_to(max(c, 1), 128) * 4

    if fused:
        fmap_bytes = _vtile(C, H * Wp)
        inter_bytes = 2 * _vtile(H * Wp, TN)      # dense weight (+ re-view)
    else:
        fmap_bytes = _vtile(C * Hp, W)
        inter_bytes = 2 * _vtile(C * Hp, TN)      # stage-1 intermediate
    io_bytes = 2 * (_vtile(3, TN) + _vtile(C, TN) + _vtile(2, TN))
    est = 2 * fmap_bytes + inter_bytes + io_bytes
    vmem_limit = int(min(96 << 20, max(32 << 20, 2 * est)))

    out_shape = (
        jax.ShapeDtypeStruct((BV, C, Np), jnp.float32),
        jax.ShapeDtypeStruct((BV, 2, Np), jnp.float32),   # [valid ; z] packed
    )

    feat, mz = pl.pallas_call(
        kernel,
        out_shape=out_shape,
        grid=(B, V, nt),
        in_specs=[
            pl.BlockSpec(memory_space=pltpu.MemorySpace.SMEM),   # K (BV*9,)
            pl.BlockSpec(memory_space=pltpu.MemorySpace.SMEM),   # E (BV*12,)
            pl.BlockSpec((1, 3, TN), lambda b, v, n: (b, 0, n)),  # pts
            fmap_spec,                                            # fmap
        ],
        out_specs=[
            pl.BlockSpec((1, C, TN), lambda b, v, n: (b * V + v, 0, n)),
            pl.BlockSpec((1, 2, TN), lambda b, v, n: (b * V + v, 0, n)),
        ],
        compiler_params=pltpu.CompilerParams(
            dimension_semantics=("parallel", "parallel", "parallel"),
            vmem_limit_bytes=vmem_limit),
    )(k_flat, e_flat, pts_f, fmap)

    feat = feat[:, :, :N].reshape(B, V, C, N)
    mz = mz[:, :, :N].reshape(B, V, 2, N)
    return feat, mz[:, :, 0:1, :], mz[:, :, 1:2, :]


def _reference(feature_maps, pts, cam_intrinsics, cam_extrinsics):
    """Pure-JAX reference matching FeatureFetcher.forward semantics."""
    B, V, C, H, W = feature_maps.shape
    N = pts.shape[2]
    BV = B * V
    fmap = feature_maps.reshape(BV, C, H, W).astype(jnp.float32)
    P = jnp.broadcast_to(pts[:, None], (B, V, 3, N)).reshape(BV, 3, N)
    Kf = cam_intrinsics.reshape(BV, 3, 3)
    Ef = cam_extrinsics.reshape(BV, 3, 4)

    cam = jnp.einsum('bij,bjn->bin', Ef[:, :, :3], P) + Ef[:, :, 3:4]
    x, y, z = cam[:, 0], cam[:, 1], cam[:, 2]
    normal = jnp.stack([x / z, y / z, jnp.ones_like(x)], axis=1)
    uv = jnp.einsum('bij,bjn->bin', Kf, normal)
    gx = (uv[:, 0] - 0.5) / float(W - 1) * 2.0 - 1.0
    gy = (uv[:, 1] - 0.5) / float(H - 1) * 2.0 - 1.0
    valid = ((jnp.abs(gx) < 1.00001) & (jnp.abs(gy) < 1.00001)).astype(jnp.float32)
    gx = jnp.where(jnp.isnan(gx), 100.0, gx)
    gy = jnp.where(jnp.isnan(gy), 100.0, gy)

    ix = ((gx + 1.0) * W - 1.0) * 0.5
    iy = ((gy + 1.0) * H - 1.0) * 0.5
    x0 = jnp.floor(ix)
    y0 = jnp.floor(iy)
    wx1 = ix - x0
    wy1 = iy - y0

    def gather(xf, yf, w):
        inb = (xf >= 0) & (xf <= W - 1) & (yf >= 0) & (yf <= H - 1)
        w = jnp.where(inb, w, 0.0)
        xi = jnp.clip(xf, 0, W - 1).astype(jnp.int32)
        yi = jnp.clip(yf, 0, H - 1).astype(jnp.int32)
        vals = jax.vmap(lambda f, yy, xx: f[:, yy, xx])(fmap, yi, xi)
        return vals * w[:, None, :]

    out = (gather(x0, y0, (1 - wy1) * (1 - wx1))
           + gather(x0 + 1, y0, (1 - wy1) * wx1)
           + gather(x0, y0 + 1, wy1 * (1 - wx1))
           + gather(x0 + 1, y0 + 1, wy1 * wx1))
    return (out.reshape(B, V, C, N),
            valid.reshape(B, V, 1, N),
            z.reshape(B, V, 1, N))


if __name__ == "__main__":
    def run_case(key, B, V, C, H, W, N, force_separable=False):
        k1, k2, k3, k4 = jax.random.split(key, 4)
        feature_maps = jax.random.normal(k1, (B, V, C, H, W), dtype=jnp.float32)
        # points in front of the camera (z in [1, 3]); some project off-image
        xy = jax.random.uniform(k2, (B, 2, N), minval=-0.8, maxval=0.8)
        zz = jax.random.uniform(k3, (B, 1, N), minval=1.0, maxval=3.0)
        pts = jnp.concatenate([xy, zz], axis=1).astype(jnp.float32)

        K_single = jnp.array([[float(W), 0.0, (W - 1) / 2.0],
                              [0.0, float(H), (H - 1) / 2.0],
                              [0.0, 0.0, 1.0]], dtype=jnp.float32)
        cam_intrinsics = jnp.broadcast_to(K_single, (B, V, 3, 3))
        R = jnp.broadcast_to(jnp.eye(3, dtype=jnp.float32), (B, V, 3, 3))
        t = jax.random.uniform(k4, (B, V, 3, 1), minval=-0.1, maxval=0.1,
                               dtype=jnp.float32)
        cam_extrinsics = jnp.concatenate([R, t], axis=-1)

        feat, mask, z = feature_fetcher(feature_maps, pts, cam_intrinsics,
                                        cam_extrinsics,
                                        force_separable=force_separable)
        jax.block_until_ready((feat, mask, z))

        feat_r, mask_r, z_r = _reference(feature_maps, pts, cam_intrinsics,
                                         cam_extrinsics)
        assert feat.shape == (B, V, C, N)
        assert mask.shape == (B, V, 1, N)
        assert z.shape == (B, V, 1, N)
        assert jnp.allclose(feat, feat_r, atol=1e-4, rtol=1e-4), "feat mismatch"
        assert jnp.allclose(mask, mask_r), "mask mismatch"
        assert jnp.allclose(z, z_r, atol=1e-5, rtol=1e-5), "z mismatch"

    key = jax.random.PRNGKey(0)
    keys = jax.random.split(key, 3)
    # fused path, aligned shapes
    run_case(keys[0], B=2, V=2, C=8, H=16, W=16, N=512)
    # fused path with W- and N-padding (W=20 -> 24, N=300 -> 512)
    run_case(keys[1], B=1, V=2, C=6, H=12, W=20, N=300)
    # separable path with H-padding (H=12 -> 16)
    run_case(keys[2], B=1, V=2, C=6, H=12, W=20, N=300, force_separable=True)

    # TODO(synk): the data-dependent NaN-diagnostic printing branch of the
    # PyTorch module is host-side debugging and is not reproduced in-kernel.
    print("KERNEL_OK")
</pallas_src>

<mosaic_0001>
module attributes {stable_mosaic.version = 11 : i64} {
  func.func @_fused_kernel(%arg0: i32, %arg1: i32, %arg2: i32, %arg3: memref<36xf32, #tpu.memory_space<smem>>, %arg4: memref<48xf32, #tpu.memory_space<smem>>, %arg5: memref<1x3x256xf32, #tpu.memory_space<vmem>>, %arg6: memref<1x8x256xf32, #tpu.memory_space<vmem>>, %arg7: memref<1x8x256xf32, #tpu.memory_space<vmem>>, %arg8: memref<1x2x256xf32, #tpu.memory_space<vmem>>) attributes {dimension_semantics = [#tpu.dimension_semantics<parallel>, #tpu.dimension_semantics<parallel>, #tpu.dimension_semantics<parallel>], iteration_bounds = array<i64: 2, 2, 2>, scalar_prefetch = 0 : i64, scratch_operands = 0 : i64, tpu.core_type = #tpu.core_type<tc>, window_params = [{transform_indices = @transform_0, window_bounds = array<i64: 36>}, {transform_indices = @transform_1, window_bounds = array<i64: 48>}, {transform_indices = @transform_2, window_bounds = array<i64: 1, 3, 256>}, {transform_indices = @transform_3, window_bounds = array<i64: 1, 8, 256>}, {transform_indices = @transform_4, window_bounds = array<i64: 1, 8, 256>}, {transform_indices = @transform_5, window_bounds = array<i64: 1, 2, 256>}]} {
    %c2_i32 = arith.constant 2 : i32
    %0 = arith.muli %arg0, %c2_i32 : i32
    %1 = arith.addi %0, %arg1 : i32
    %c0 = arith.constant 0 : index
    %c0_0 = arith.constant 0 : index
    %c0_1 = arith.constant 0 : index
    %2 = vector.load %arg5[%c0, %c0_0, %c0_1] : memref<1x3x256xf32, #tpu.memory_space<vmem>>, vector<1x3x256xf32>
    %3 = vector.shape_cast %2 : vector<1x3x256xf32> to vector<3x256xf32>
    %4 = vector.extract_strided_slice %3 {offsets = [0, 0], sizes = [1, 256], strides = [1, 1]} : vector<3x256xf32> to vector<1x256xf32>
    %5 = vector.extract_strided_slice %3 {offsets = [1, 0], sizes = [1, 256], strides = [1, 1]} : vector<3x256xf32> to vector<1x256xf32>
    %6 = vector.extract_strided_slice %3 {offsets = [2, 0], sizes = [1, 256], strides = [1, 1]} : vector<3x256xf32> to vector<1x256xf32>
    %c12_i32 = arith.constant 12 : i32
    %7 = arith.muli %1, %c12_i32 : i32
    %c0_i32 = arith.constant 0 : i32
    %8 = arith.addi %7, %c0_i32 : i32
    %c0_i32_2 = arith.constant 0 : i32
    %9 = arith.addi %8, %c0_i32_2 : i32
    %10 = arith.index_cast %9 : i32 to index
    %11 = memref.load %arg4[%10] : memref<48xf32, #tpu.memory_space<smem>>
    %12 = vector.broadcast %11 : f32 to vector<1x256xf32>
    %13 = arith.mulf %12, %4 : vector<1x256xf32>
    %c12_i32_3 = arith.constant 12 : i32
    %14 = arith.muli %1, %c12_i32_3 : i32
    %c0_i32_4 = arith.constant 0 : i32
    %15 = arith.addi %14, %c0_i32_4 : i32
    %c1_i32 = arith.constant 1 : i32
    %16 = arith.addi %15, %c1_i32 : i32
    %17 = arith.index_cast %16 : i32 to index
    %18 = memref.load %arg4[%17] : memref<48xf32, #tpu.memory_space<smem>>
    %19 = vector.broadcast %18 : f32 to vector<1x256xf32>
    %20 = arith.mulf %19, %5 : vector<1x256xf32>
    %21 = arith.addf %13, %20 : vector<1x256xf32>
    %c12_i32_5 = arith.constant 12 : i32
    %22 = arith.muli %1, %c12_i32_5 : i32
    %c0_i32_6 = arith.constant 0 : i32
    %23 = arith.addi %22, %c0_i32_6 : i32
    %c2_i32_7 = arith.constant 2 : i32
    %24 = arith.addi %23, %c2_i32_7 : i32
    %25 = arith.index_cast %24 : i32 to index
    %26 = memref.load %arg4[%25] : memref<48xf32, #tpu.memory_space<smem>>
    %27 = vector.broadcast %26 : f32 to vector<1x256xf32>
    %28 = arith.mulf %27, %6 : vector<1x256xf32>
    %29 = arith.addf %21, %28 : vector<1x256xf32>
    %c12_i32_8 = arith.constant 12 : i32
    %30 = arith.muli %1, %c12_i32_8 : i32
    %c0_i32_9 = arith.constant 0 : i32
    %31 = arith.addi %30, %c0_i32_9 : i32
    %c3_i32 = arith.constant 3 : i32
    %32 = arith.addi %31, %c3_i32 : i32
    %33 = arith.index_cast %32 : i32 to index
    %34 = memref.load %arg4[%33] : memref<48xf32, #tpu.memory_space<smem>>
    %35 = vector.broadcast %34 : f32 to vector<1x256xf32>
    %36 = arith.addf %29, %35 : vector<1x256xf32>
    %c12_i32_10 = arith.constant 12 : i32
    %37 = arith.muli %1, %c12_i32_10 : i32
    %c4_i32 = arith.constant 4 : i32
    %38 = arith.addi %37, %c4_i32 : i32
    %c0_i32_11 = arith.constant 0 : i32
    %39 = arith.addi %38, %c0_i32_11 : i32
    %40 = arith.index_cast %39 : i32 to index
    %41 = memref.load %arg4[%40] : memref<48xf32, #tpu.memory_space<smem>>
    %42 = vector.broadcast %41 : f32 to vector<1x256xf32>
    %43 = arith.mulf %42, %4 : vector<1x256xf32>
    %c12_i32_12 = arith.constant 12 : i32
    %44 = arith.muli %1, %c12_i32_12 : i32
    %c4_i32_13 = arith.constant 4 : i32
    %45 = arith.addi %44, %c4_i32_13 : i32
    %c1_i32_14 = arith.constant 1 : i32
    %46 = arith.addi %45, %c1_i32_14 : i32
    %47 = arith.index_cast %46 : i32 to index
    %48 = memref.load %arg4[%47] : memref<48xf32, #tpu.memory_space<smem>>
    %49 = vector.broadcast %48 : f32 to vector<1x256xf32>
    %50 = arith.mulf %49, %5 : vector<1x256xf32>
    %51 = arith.addf %43, %50 : vector<1x256xf32>
    %c12_i32_15 = arith.constant 12 : i32
    %52 = arith.muli %1, %c12_i32_15 : i32
    %c4_i32_16 = arith.constant 4 : i32
    %53 = arith.addi %52, %c4_i32_16 : i32
    %c2_i32_17 = arith.constant 2 : i32
    %54 = arith.addi %53, %c2_i32_17 : i32
    %55 = arith.index_cast %54 : i32 to index
    %56 = memref.load %arg4[%55] : memref<48xf32, #tpu.memory_space<smem>>
    %57 = vector.broadcast %56 : f32 to vector<1x256xf32>
    %58 = arith.mulf %57, %6 : vector<1x256xf32>
    %59 = arith.addf %51, %58 : vector<1x256xf32>
    %c12_i32_18 = arith.constant 12 : i32
    %60 = arith.muli %1, %c12_i32_18 : i32
    %c4_i32_19 = arith.constant 4 : i32
    %61 = arith.addi %60, %c4_i32_19 : i32
    %c3_i32_20 = arith.constant 3 : i32
    %62 = arith.addi %61, %c3_i32_20 : i32
    %63 = arith.index_cast %62 : i32 to index
    %64 = memref.load %arg4[%63] : memref<48xf32, #tpu.memory_space<smem>>
    %65 = vector.broadcast %64 : f32 to vector<1x256xf32>
    %66 = arith.addf %59, %65 : vector<1x256xf32>
    %c12_i32_21 = arith.constant 12 : i32
    %67 = arith.muli %1, %c12_i32_21 : i32
    %c8_i32 = arith.constant 8 : i32
    %68 = arith.addi %67, %c8_i32 : i32
    %c0_i32_22 = arith.constant 0 : i32
    %69 = arith.addi %68, %c0_i32_22 : i32
    %70 = arith.index_cast %69 : i32 to index
    %71 = memref.load %arg4[%70] : memref<48xf32, #tpu.memory_space<smem>>
    %72 = vector.broadcast %71 : f32 to vector<1x256xf32>
    %73 = arith.mulf %72, %4 : vector<1x256xf32>
    %c12_i32_23 = arith.constant 12 : i32
    %74 = arith.muli %1, %c12_i32_23 : i32
    %c8_i32_24 = arith.constant 8 : i32
    %75 = arith.addi %74, %c8_i32_24 : i32
    %c1_i32_25 = arith.constant 1 : i32
    %76 = arith.addi %75, %c1_i32_25 : i32
    %77 = arith.index_cast %76 : i32 to index
    %78 = memref.load %arg4[%77] : memref<48xf32, #tpu.memory_space<smem>>
    %79 = vector.broadcast %78 : f32 to vector<1x256xf32>
    %80 = arith.mulf %79, %5 : vector<1x256xf32>
    %81 = arith.addf %73, %80 : vector<1x256xf32>
    %c12_i32_26 = arith.constant 12 : i32
    %82 = arith.muli %1, %c12_i32_26 : i32
    %c8_i32_27 = arith.constant 8 : i32
    %83 = arith.addi %82, %c8_i32_27 : i32
    %c2_i32_28 = arith.constant 2 : i32
    %84 = arith.addi %83, %c2_i32_28 : i32
    %85 = arith.index_cast %84 : i32 to index
    %86 = memref.load %arg4[%85] : memref<48xf32, #tpu.memory_space<smem>>
    %87 = vector.broadcast %86 : f32 to vector<1x256xf32>
    %88 = arith.mulf %87, %6 : vector<1x256xf32>
    %89 = arith.addf %81, %88 : vector<1x256xf32>
    %c12_i32_29 = arith.constant 12 : i32
    %90 = arith.muli %1, %c12_i32_29 : i32
    %c8_i32_30 = arith.constant 8 : i32
    %91 = arith.addi %90, %c8_i32_30 : i32
    %c3_i32_31 = arith.constant 3 : i32
    %92 = arith.addi %91, %c3_i32_31 : i32
    %93 = arith.index_cast %92 : i32 to index
    %94 = memref.load %arg4[%93] : memref<48xf32, #tpu.memory_space<smem>>
    %95 = vector.broadcast %94 : f32 to vector<1x256xf32>
    %96 = arith.addf %89, %95 : vector<1x256xf32>
    %97 = tpu.reciprocal %96 : vector<1x256xf32> -> vector<1x256xf32>
    %98 = arith.mulf %36, %97 : vector<1x256xf32>
    %99 = arith.mulf %66, %97 : vector<1x256xf32>
    %c9_i32 = arith.constant 9 : i32
    %100 = arith.muli %1, %c9_i32 : i32
    %c0_i32_32 = arith.constant 0 : i32
    %101 = arith.addi %100, %c0_i32_32 : i32
    %c0_i32_33 = arith.constant 0 : i32
    %102 = arith.addi %101, %c0_i32_33 : i32
    %103 = arith.index_cast %102 : i32 to index
    %104 = memref.load %arg3[%103] : memref<36xf32, #tpu.memory_space<smem>>
    %105 = vector.broadcast %104 : f32 to vector<1x256xf32>
    %106 = arith.mulf %105, %98 : vector<1x256xf32>
    %c9_i32_34 = arith.constant 9 : i32
    %107 = arith.muli %1, %c9_i32_34 : i32
    %c0_i32_35 = arith.constant 0 : i32
    %108 = arith.addi %107, %c0_i32_35 : i32
    %c1_i32_36 = arith.constant 1 : i32
    %109 = arith.addi %108, %c1_i32_36 : i32
    %110 = arith.index_cast %109 : i32 to index
    %111 = memref.load %arg3[%110] : memref<36xf32, #tpu.memory_space<smem>>
    %112 = vector.broadcast %111 : f32 to vector<1x256xf32>
    %113 = arith.mulf %112, %99 : vector<1x256xf32>
    %114 = arith.addf %106, %113 : vector<1x256xf32>
    %c9_i32_37 = arith.constant 9 : i32
    %115 = arith.muli %1, %c9_i32_37 : i32
    %c0_i32_38 = arith.constant 0 : i32
    %116 = arith.addi %115, %c0_i32_38 : i32
    %c2_i32_39 = arith.constant 2 : i32
    %117 = arith.addi %116, %c2_i32_39 : i32
    %118 = arith.index_cast %117 : i32 to index
    %119 = memref.load %arg3[%118] : memref<36xf32, #tpu.memory_space<smem>>
    %120 = vector.broadcast %119 : f32 to vector<1x256xf32>
    %121 = arith.addf %114, %120 : vector<1x256xf32>
    %c9_i32_40 = arith.constant 9 : i32
    %122 = arith.muli %1, %c9_i32_40 : i32
    %c3_i32_41 = arith.constant 3 : i32
    %123 = arith.addi %122, %c3_i32_41 : i32
    %c0_i32_42 = arith.constant 0 : i32
    %124 = arith.addi %123, %c0_i32_42 : i32
    %125 = arith.index_cast %124 : i32 to index
    %126 = memref.load %arg3[%125] : memref<36xf32, #tpu.memory_space<smem>>
    %127 = vector.broadcast %126 : f32 to vector<1x256xf32>
    %128 = arith.mulf %127, %98 : vector<1x256xf32>
    %c9_i32_43 = arith.constant 9 : i32
    %129 = arith.muli %1, %c9_i32_43 : i32
    %c3_i32_44 = arith.constant 3 : i32
    %130 = arith.addi %129, %c3_i32_44 : i32
    %c1_i32_45 = arith.constant 1 : i32
    %131 = arith.addi %130, %c1_i32_45 : i32
    %132 = arith.index_cast %131 : i32 to index
    %133 = memref.load %arg3[%132] : memref<36xf32, #tpu.memory_space<smem>>
    %134 = vector.broadcast %133 : f32 to vector<1x256xf32>
    %135 = arith.mulf %134, %99 : vector<1x256xf32>
    %136 = arith.addf %128, %135 : vector<1x256xf32>
    %c9_i32_46 = arith.constant 9 : i32
    %137 = arith.muli %1, %c9_i32_46 : i32
    %c3_i32_47 = arith.constant 3 : i32
    %138 = arith.addi %137, %c3_i32_47 : i32
    %c2_i32_48 = arith.constant 2 : i32
    %139 = arith.addi %138, %c2_i32_48 : i32
    %140 = arith.index_cast %139 : i32 to index
    %141 = memref.load %arg3[%140] : memref<36xf32, #tpu.memory_space<smem>>
    %142 = vector.broadcast %141 : f32 to vector<1x256xf32>
    %143 = arith.addf %136, %142 : vector<1x256xf32>
    %cst = arith.constant 5.000000e-01 : f32
    %144 = vector.broadcast %cst : f32 to vector<1x256xf32>
    %145 = arith.subf %121, %144 : vector<1x256xf32>
    %cst_49 = arith.constant 1.500000e+01 : f32
    %146 = vector.broadcast %cst_49 : f32 to vector<1x256xf32>
    %147 = arith.divf %145, %146 : vector<1x256xf32>
    %cst_50 = arith.constant 2.000000e+00 : f32
    %148 = vector.broadcast %cst_50 : f32 to vector<1x256xf32>
    %149 = arith.mulf %147, %148 : vector<1x256xf32>
    %cst_51 = arith.constant 1.000000e+00 : f32
    %150 = vector.broadcast %cst_51 : f32 to vector<1x256xf32>
    %151 = arith.subf %149, %150 : vector<1x256xf32>
    %cst_52 = arith.constant 5.000000e-01 : f32
    %152 = vector.broadcast %cst_52 : f32 to vector<1x256xf32>
    %153 = arith.subf %143, %152 : vector<1x256xf32>
    %cst_53 = arith.constant 1.500000e+01 : f32
    %154 = vector.broadcast %cst_53 : f32 to vector<1x256xf32>
    %155 = arith.divf %153, %154 : vector<1x256xf32>
    %cst_54 = arith.constant 2.000000e+00 : f32
    %156 = vector.broadcast %cst_54 : f32 to vector<1x256xf32>
    %157 = arith.mulf %155, %156 : vector<1x256xf32>
    %cst_55 = arith.constant 1.000000e+00 : f32
    %158 = vector.broadcast %cst_55 : f32 to vector<1x256xf32>
    %159 = arith.subf %157, %158 : vector<1x256xf32>
    %160 = math.absf %151 : vector<1x256xf32>
    %cst_56 = arith.constant 1.000010e+00 : f32
    %161 = vector.broadcast %cst_56 : f32 to vector<1x256xf32>
    %162 = arith.cmpf olt, %160, %161 : vector<1x256xf32>
    %163 = math.absf %159 : vector<1x256xf32>
    %cst_57 = arith.constant 1.000010e+00 : f32
    %164 = vector.broadcast %cst_57 : f32 to vector<1x256xf32>
    %165 = arith.cmpf olt, %163, %164 : vector<1x256xf32>
    %166 = arith.andi %162, %165 : vector<1x256xi1>
    %cst_58 = arith.constant 1.000000e+00 : f32
    %cst_59 = arith.constant 0.000000e+00 : f32
    %167 = vector.broadcast %cst_58 : f32 to vector<1x256xf32>
    %168 = vector.broadcast %cst_59 : f32 to vector<1x256xf32>
    %169 = arith.select %166, %167, %168 : vector<1x256xi1>, vector<1x256xf32>
    %170 = arith.cmpf one, %151, %151 : vector<1x256xf32>
    %cst_60 = arith.constant 1.000000e+02 : f32
    %171 = vector.broadcast %cst_60 : f32 to vector<1x256xf32>
    %172 = arith.select %170, %171, %151 : vector<1x256xi1>, vector<1x256xf32>
    %173 = arith.cmpf one, %159, %159 : vector<1x256xf32>
    %cst_61 = arith.constant 1.000000e+02 : f32
    %174 = vector.broadcast %cst_61 : f32 to vector<1x256xf32>
    %175 = arith.select %173, %174, %159 : vector<1x256xi1>, vector<1x256xf32>
    %cst_62 = arith.constant 1.000000e+00 : f32
    %176 = vector.broadcast %cst_62 : f32 to vector<1x256xf32>
    %177 = arith.addf %172, %176 : vector<1x256xf32>
    %cst_63 = arith.constant 1.600000e+01 : f32
    %178 = vector.broadcast %cst_63 : f32 to vector<1x256xf32>
    %179 = arith.mulf %177, %178 : vector<1x256xf32>
    %cst_64 = arith.constant 1.000000e+00 : f32
    %180 = vector.broadcast %cst_64 : f32 to vector<1x256xf32>
    %181 = arith.subf %179, %180 : vector<1x256xf32>
    %cst_65 = arith.constant 5.000000e-01 : f32
    %182 = vector.broadcast %cst_65 : f32 to vector<1x256xf32>
    %183 = arith.mulf %181, %182 : vector<1x256xf32>
    %cst_66 = arith.constant 1.000000e+00 : f32
    %184 = vector.broadcast %cst_66 : f32 to vector<1x256xf32>
    %185 = arith.addf %175, %184 : vector<1x256xf32>
    %cst_67 = arith.constant 1.600000e+01 : f32
    %186 = vector.broadcast %cst_67 : f32 to vector<1x256xf32>
    %187 = arith.mulf %185, %186 : vector<1x256xf32>
    %cst_68 = arith.constant 1.000000e+00 : f32
    %188 = vector.broadcast %cst_68 : f32 to vector<1x256xf32>
    %189 = arith.subf %187, %188 : vector<1x256xf32>
    %cst_69 = arith.constant 5.000000e-01 : f32
    %190 = vector.broadcast %cst_69 : f32 to vector<1x256xf32>
    %191 = arith.mulf %189, %190 : vector<1x256xf32>
    %192 = tpu.iota {dimensions = array<i32: 0>} : vector<16x256xi32>
    %193 = arith.sitofp %192 : vector<16x256xi32> to vector<16x256xf32>
    %194 = tpu.iota {dimensions = array<i32: 0>} : vector<16x256xi32>
    %195 = arith.sitofp %194 : vector<16x256xi32> to vector<16x256xf32>
    %196 = vector.broadcast %183 : vector<1x256xf32> to vector<16x256xf32>
    %197 = arith.subf %196, %193 : vector<16x256xf32>
    %198 = math.absf %197 : vector<16x256xf32>
    %cst_70 = arith.constant 1.000000e+00 : f32
    %199 = vector.broadcast %cst_70 : f32 to vector<16x256xf32>
    %200 = arith.subf %199, %198 : vector<16x256xf32>
    %cst_71 = arith.constant 0.000000e+00 : f32
    %201 = vector.broadcast %cst_71 : f32 to vector<16x256xf32>
    %202 = arith.maximumf %200, %201 : vector<16x256xf32>
    %203 = vector.broadcast %191 : vector<1x256xf32> to vector<16x256xf32>
    %204 = arith.subf %203, %195 : vector<16x256xf32>
    %205 = math.absf %204 : vector<16x256xf32>
    %cst_72 = arith.constant 1.000000e+00 : f32
    %206 = vector.broadcast %cst_72 : f32 to vector<16x256xf32>
    %207 = arith.subf %206, %205 : vector<16x256xf32>
    %cst_73 = arith.constant 0.000000e+00 : f32
    %208 = vector.broadcast %cst_73 : f32 to vector<16x256xf32>
    %209 = arith.maximumf %207, %208 : vector<16x256xf32>
    %210 = vector.shape_cast %209 : vector<16x256xf32> to vector<16x1x256xf32>
    %211 = vector.shape_cast %202 : vector<16x256xf32> to vector<1x16x256xf32>
    %212 = vector.broadcast %210 : vector<16x1x256xf32> to vector<16x16x256xf32>
    %213 = vector.broadcast %211 : vector<1x16x256xf32> to vector<16x16x256xf32>
    %214 = arith.mulf %212, %213 : vector<16x16x256xf32>
    %215 = vector.shape_cast %214 : vector<16x16x256xf32> to vector<256x256xf32>
    %c0_74 = arith.constant 0 : index
    %c0_75 = arith.constant 0 : index
    %c0_76 = arith.constant 0 : index
    %216 = vector.load %arg6[%c0_74, %c0_75, %c0_76] : memref<1x8x256xf32, #tpu.memory_space<vmem>>, vector<1x8x256xf32>
    %217 = vector.shape_cast %216 : vector<1x8x256xf32> to vector<8x256xf32>
    %cst_77 = arith.constant dense<0.000000e+00> : vector<8x256xf32>
    %218 = tpu.matmul %217, %215, %cst_77 {dimension_numbers = #tpu.dot_dimension_numbers<[1], [0], [0], [1], [0, 0, 1, 1], [], []>} : vector<8x256xf32>, vector<256x256xf32>, vector<8x256xf32> -> vector<8x256xf32>
    %c0_78 = arith.constant 0 : index
    %c0_79 = arith.constant 0 : index
    %c0_80 = arith.constant 0 : index
    %219 = vector.load %arg7[%c0_78, %c0_79, %c0_80] : memref<1x8x256xf32, #tpu.memory_space<vmem>>, vector<1x8x256xf32>
    %220 = vector.shape_cast %219 : vector<1x8x256xf32> to vector<8x256xf32>
    %221 = vector.shape_cast %218 : vector<8x256xf32> to vector<1x8x256xf32>
    tpu.vector_store %arg7[%c0_78, %c0_79, %c0_80], %221 {strides = array<i32>} : memref<1x8x256xf32, #tpu.memory_space<vmem>>, vector<1x8x256xf32>,
    %222 = tpu.concatenate %169, %96 in 0 : vector<1x256xf32>, vector<1x256xf32> -> vector<2x256xf32>
    %c0_81 = arith.constant 0 : index
    %c0_82 = arith.constant 0 : index
    %c0_83 = arith.constant 0 : index
    %223 = vector.load %arg8[%c0_81, %c0_82, %c0_83] : memref<1x2x256xf32, #tpu.memory_space<vmem>>, vector<1x2x256xf32>
    %224 = vector.shape_cast %223 : vector<1x2x256xf32> to vector<2x256xf32>
    %225 = vector.shape_cast %222 : vector<2x256xf32> to vector<1x2x256xf32>
    tpu.vector_store %arg8[%c0_81, %c0_82, %c0_83], %225 {strides = array<i32>} : memref<1x2x256xf32, #tpu.memory_space<vmem>>, vector<1x2x256xf32>,
    return
  }
  func.func @transform_0(%arg0: i32, %arg1: i32, %arg2: i32) -> i32 {
    %c0_i32 = arith.constant 0 : i32
    %c0_i32_0 = arith.constant 0 : i32
    return %c0_i32 : i32
  }
  func.func @transform_1(%arg0: i32, %arg1: i32, %arg2: i32) -> i32 {
    %c0_i32 = arith.constant 0 : i32
    %c0_i32_0 = arith.constant 0 : i32
    return %c0_i32 : i32
  }
  func.func @transform_2(%arg0: i32, %arg1: i32, %arg2: i32) -> (i32, i32, i32) {
    %c0_i32 = arith.constant 0 : i32
    %c0_i32_0 = arith.constant 0 : i32
    return %arg0, %c0_i32, %arg2 : i32, i32, i32
  }
  func.func @transform_3(%arg0: i32, %arg1: i32, %arg2: i32) -> (i32, i32, i32) {
    %c2_i32 = arith.constant 2 : i32
    %0 = arith.muli %arg0, %c2_i32 : i32
    %1 = arith.addi %0, %arg1 : i32
    %c0_i32 = arith.constant 0 : i32
    %c0_i32_0 = arith.constant 0 : i32
    %c0_i32_1 = arith.constant 0 : i32
    return %1, %c0_i32, %c0_i32_0 : i32, i32, i32
  }
  func.func @transform_4(%arg0: i32, %arg1: i32, %arg2: i32) -> (i32, i32, i32) {
    %c2_i32 = arith.constant 2 : i32
    %0 = arith.muli %arg0, %c2_i32 : i32
    %1 = arith.addi %0, %arg1 : i32
    %c0_i32 = arith.constant 0 : i32
    %c0_i32_0 = arith.constant 0 : i32
    return %1, %c0_i32, %arg2 : i32, i32, i32
  }
  func.func @transform_5(%arg0: i32, %arg1: i32, %arg2: i32) -> (i32, i32, i32) {
    %c2_i32 = arith.constant 2 : i32
    %0 = arith.muli %arg0, %c2_i32 : i32
    %1 = arith.addi %0, %arg1 : i32
    %c0_i32 = arith.constant 0 : i32
    %c0_i32_0 = arith.constant 0 : i32
    return %1, %c0_i32, %arg2 : i32, i32, i32
  }
}

</mosaic_0001>

<bundles_post_ra>
// kernel: tpu_custom_call.1
= control target key start
LH: loop header
LB: loop body
LE: loop exit
PB: predicated region body
PF: predicated region fallthrough
CT: control target
= control target key end

     0   :  { %s2004_s0 = inlined_call_operand.vmem [shape: f32[36], index: 0, kind: input, shape index: {}]   ;;  %s2005_s1 = inlined_call_operand.vmem [shape: f32[48], index: 1, kind: input, shape index: {}]   ;;  %s2006_s2 = inlined_call_operand.vmem [shape: f32[2,3,512], index: 2, kind: input, shape index: {}]   ;;  %s2007_s3 = inlined_call_operand.hbm [shape: f32[4,8,256], index: 3, kind: input, shape index: {}]   ;;  %s2008_s4 = inlined_call_operand.hbm [shape: f32[4,8,512], index: 4, kind: output, shape index: {0}]   ;;  %s2009_s5 = inlined_call_operand.hbm [shape: f32[4,2,512], index: 5, kind: output, shape index: {1}]  }
   0x1   :  { %2024 = sst [smem:[#allocation29_spill]] %s2004_s0 }
   0x2   :  { %2025 = sst [smem:[#allocation30_spill]] %s2005_s1 }
   0x3   :  { %2026 = sst [smem:[#allocation31_spill]] %s2006_s2 }
   0x4   :  { %2027 = sst [smem:[#allocation32_spill]] %s2007_s3 }
   0x5   :  { %2028 = sst [smem:[#allocation33_spill]] %s2008_s4 }
   0x6   :  { %2029 = sst [smem:[#allocation34_spill]] %s2009_s5 }
   0x7   :  { %11 = vsyncpa [#allocation5], 0 }
   0x8   :  { %12 = vsyncpa [#allocation7], 0 }
   0x9   :  { %13 = vsyncpa [#allocation3], 0 }
   0xa   :  { %15 = vsyncpa [#allocation3 + $0x1], 0 }
   0xb   :  { %16 = vsyncpa [#allocation4], 0 }
   0xc   :  { %18 = vsyncpa [#allocation4 + $0x1], 0 }
   0xd   :  { %19 = vsyncpa [#allocation11], 0 }
   0xe   :  { %21 = vsyncpa [#allocation11 + $0x1], 0  ;;  %s1536_s18 = smov 0   ;;  %s1538_s19 = smov 0  }
   0xf   :  { %s1540_s20 = smov 0   ;;  %s1542_s21 = smov 0  }
  0x10   :  { %s1544_s22 = smov 0   ;;  %s1546_s23 = smov 0  }
  0x11   :  { %s1548_s24 = smov 0   ;;  %s1550_s25 = smov 0  }
  0x12   :  { %s1552_s26 = smov 0   ;;  %s1554_s27 = smov 0  }
  0x13   :  { %s1556_s28 = smov 0   ;;  %s1558_s29 = smov 0  }
  0x14   :  { %s1560_s30 = smov 0  }
  0x15 LB: > { %2030 = sst [smem:[#allocation17_spill]] %s1452_s18  ;;  %s1061_s6 = sadd.s32 4294967295, %s1500_s30   ;;  %s1500_s30 = sphi %s1560_s30, %s27_s30   ;;  %s1496_s29 = sphi %s1558_s29, %s2078_s29   ;;  %s1492_s28 = sphi %s1556_s28, %s2069_s28   ;;  %s1488_s27 = sphi %s1554_s27, %s2077_s27   ;;  %s1484_s26 = sphi %s1552_s26, %s2067_s26   ;;  %s1480_s25 = sphi %s1550_s25, %s2076_s25   ;;  %s1476_s24 = sphi %s1548_s24, %s2065_s24   ;;  %s1472_s23 = sphi %s1546_s23, %s2075_s23   ;;  %s1468_s22 = sphi %s1544_s22, %s2074_s22   ;;  %s1464_s21 = sphi %s1542_s21, %s2073_s21   ;;  %s1460_s20 = sphi %s1540_s20, %s2072_s20   ;;  %s1456_s19 = sphi %s1538_s19, %s2071_s19   ;;  %s1452_s18 = sphi %s1536_s18, %s2063_s18  }
  0x16   : > { %2031 = sst [smem:[#allocation18_spill]] %s1456_s19  ;;  %s1062_s7 = sadd.s32 4294967294, %s1500_s30  }
  0x17   : > { %2032 = sst [smem:[#allocation19_spill]] %s1480_s25  ;;  %p140_p0 = scmp.ne.s32.totalorder %s1468_s22, %s1464_s21 }
  0x18   : > { %2033 = sst [smem:[#allocation20_spill]] %s1484_s26  ;;  %p1602_p1 = scmp.eq.s32.totalorder %s1061_s6, 0 }
  0x19   : > { %2034 = sst [smem:[#allocation21_spill]] %s1488_s27  ;;  %p169_p2 = scmp.ne.s32.totalorder %s1460_s20, %s1456_s19 }
  0x1a   : > { %2035 = sst [smem:[#allocation22_spill]] %s1492_s28  ;;  %p170_p3 = scmp.eq.s32.totalorder %s1061_s6, 7 }
  0x1b   : > { %2036 = sst [smem:[#allocation23_spill]] %s1496_s29  ;;  %p1610_p4 = por %p1602_p1, %p140_p0 }
  0x1c   : > { %p175_p5 = scmp.ne.s32.totalorder %s1456_s19, %s1452_s18  ;;  %p1616_p6 = por %p170_p3, %p169_p2 }
  0x1d   : > { %p176_p7 = scmp.eq.s32.totalorder %s1062_s7, 7  ;;  %p1069_p8 = scmp.ge.s32.totalorder %s1500_s30, 1 }
  0x1e   : > { %s2039_s10 = scalar_select %p1616_p6, 1, 0 }
  0x1f   : > { %p215_p9 = scmp.lt.s32.totalorder %s1500_s30, 9  ;;  %p1622_p10 = por %p176_p7, %p175_p5 }
  0x20   : > { %2040 = sst [smem:[#allocation24_spill]] %s2039_s10  ;;  %s1502_s6 = smov [#allocation2]  }
  0x21   : > { %s2041_s11 = scalar_select %p1622_p10, 1, 0 }
  0x22   : > { %p1626_p11 = pnand %p1069_p8, %p215_p9  ;;  %s2044_s0 = sld [smem:[#allocation29_spill]] }
  0x23   : > { %2042 = sst [smem:[#allocation25_spill]] %s2041_s11  ;;  %s1503_s7 = smov [#allocation6]  }
  0x24   : > { %p1126_p12 = pneg %p1626_p11  ;;  %s2045_s1 = sld [smem:[#allocation30_spill]] }
  0x25   : > { %s39_s13 = sadd.s32 1, %s1488_s27  ;;  %s42_s14 = sadd.s32 1, %s1492_s28 }
  0x26   : > { %p1127_p13 = pnand %p1126_p12, %p1602_p1  ;;  %p40_p0 = scmp.ge.s32.totalorder %s39_s13, 2 }
  0x27   : > { %s46_s16 = sadd.s32 1, %s1496_s29  ;;  %s1063_s17 = sshll.u32 %s1496_s29, 1 }
  0x28   : > { %s227_s15 = sshll.u32 %s2044_s0, 4  ;;  %s2080_s13 = smov (%p40_p0, %s39_s13), 0  ;;  %s228_s15 = int_to_ptr.vmem [resolvable:$true] %s227_s15 }
  0x29   : > { %1129 = dma.vmem_to_smem (!%p1127_p13), %s228_s15, 16, %s1502_s6, [#allocation5]  }
  0x2a   : > { %s237_s21 = sshll.u32 %s2045_s1, 4  ;;  %2046 = sst [smem:[#allocation26_spill]] %s2080_s13  ;;  %s238_s21 = int_to_ptr.vmem [resolvable:$true] %s237_s21 }
  0x2b   : > { %1132 = dma.vmem_to_smem (!%p1127_p13), %s238_s21, 16, %s1503_s7, [#allocation7]  }
  0x2c   : > { %s2082_s14 = smov (!%p40_p0, %s42_s14), %s1492_s28  ;;  %s121_s0 = sadd.s32 %s1492_s28, %s1063_s17 }
  0x2d   : > { %s127_s1 = sadd.s32 1, %s1472_s23  ;;  %p44_p2 = scmp.ge.s32.totalorder %s2082_s14, 2 }
  0x2e   : > { %p134_p3 = scmp.ne.s32.totalorder %s1472_s23, %s1468_s22  ;;  %p135_p5 = scmp.eq.s32.totalorder %s1500_s30, 0 }
  0x2f   : > { %s155_s15 = ssub.s32 %s1488_s27, %s2080_s13  ;;  %s2084_s14 = smov (%p44_p2, %s2082_s14), 0 }
  0x30   : > { %2047 = sst [smem:[#allocation27_spill]] %s2084_s14  ;;  %s2086_s16 = smov (!%p44_p2, %s46_s16), %s1496_s29 }
  0x31   : > { %p1657_p7 = por %p135_p5, %p134_p3  ;;  %s159_s6 = sadd.s32 1, %s1460_s20 }
  0x32   : > { %p48_p8 = scmp.ge.s32.totalorder %s2086_s16, 2  ;;  %p1146_p9 = scmp.lt.s32.totalorder %s1500_s30, 8 }
  0x33   : > { %s261_s7 = sand.u32 1, %s1472_s23   ;;  %s1111_s17 = sshll.u32 %s121_s0, 4 }
  0x34   : > { %s2088_s16 = smov (%p48_p8, %s2086_s16), 0  ;;  %s1073_s13 = sshll.u32 %s261_s7, 4 }
  0x35   : > { %2049 = sst [smem:[#allocation28_spill]] %s2088_s16  ;;  %s1064_s28 = sshll.u32 %s2088_s16, 1 }
  0x36   : > { %s123_s27 = sadd.s32 %s1064_s28, %s2084_s14  ;;  %s2050_s3 = sld [smem:[#allocation32_spill]] }
  0x37   : > { %s124_s4 = ssub.s32 %s121_s0, %s123_s27  ;;  %s265_s25 = scalar_lea.vmem [#allocation8], %s1073_s13 }
  0x38   : > { %p125_p12 = scmp.eq.s32.totalorder %s124_s4, 0  ;;  %s156_s5 = sor.u32 %s155_s15, %s124_s4 }
  0x39   : > { %p157_p13 = scmp.eq.s32.totalorder %s156_s5, 0  ;;  %s276_s26 = sshll.u32 %s265_s25, 4  ;;  %s277_s26 = int_to_ptr.vmem [resolvable:$true] %s276_s26 }
  0x3a   : > { %s1672_s19 = scalar_select %p125_p12, %s1472_s23, %s127_s1  }
  0x3b   : > { %s1675_s2 = scalar_select %p157_p13, %s1460_s20, %s159_s6  }
  0x3c   : > { %s272_s18 = scalar_lea.hbm %s2050_s3, %s1111_s17  ;;  %p1134_p0 = pnand %p1146_p9, %p1657_p7 }
  0x3d   : > { %s274_s10 = sshll.u32 %s272_s18, 4  ;;  %s262_s28 = scalar_lea.sflag [#allocation3], %s261_s7  ;;  %s275_s10 = int_to_ptr.hbm [resolvable:$true] %s274_s10 }
  0x3e   : > { %1136 = dma.hbm_to_vmem [thread:$0]  (!%p1134_p0), %s275_s10, 256, %s277_s26, %s262_s28  }
  0x3f   : > { %285 = sbr.rel (%p1626_p11) target bundleno = 344 (0x158), region = 36 }
  0x44   : > { %1431 = dma.done.wait (%p1602_p1), [#allocation5], 16  }
  0x45   : > { %1433 = vsyncadd (%p1602_p1), [#allocation5], 4294967280 }
  0x46   : > { %1435 = dma.done.wait (%p1602_p1), [#allocation7], 16  }
  0x47   : > { %1437 = vsyncadd (%p1602_p1), [#allocation7], 4294967280  ;;  %s297_s0 = sand.u32 1, %s1468_s22  }
  0x48   : > { %s1692_s1 = sshll.u32 %s297_s0, 4  ;;  %s298_s4 = scalar_lea.sflag [#allocation3], %s297_s0 }
  0x49   : > { %1439 = dma.done.wait (%p1610_p4), %s298_s4, 256  }
  0x4a   : > { %1441 = vsyncadd (%p1610_p4), %s298_s4, 4294967040 }
  0x4b   : > { %307 = sfence }
  0x4c   : > { %s2051_s18 = sld [smem:[#allocation20_spill]]  ;;  %s1700_s26 = sshll.u32 %s1476_s24, 1  ;;  %v1504_v21 = vmov 15.0   ;;  %vm595_vm7 = vcmask 1046528   ;;  %vm592_vm8 = vcmask 1046534   ;;  %vm589_vm9 = vcmask 1045509  }
  0x4d   : > { %s2052_s25 = sld [smem:[#allocation19_spill]]  ;;  %p347_p11 = scmp.lt.s32.totalorder %s1700_s26, 3  ;;  %1258 = vrcp.f32 %v1504_v21  ;;  %vm586_vm10 = vcmask 1044484   ;;  %vm583_vm11 = vcmask 1043459   ;;  %vm580_vm12 = vcmask 1042434  }
  0x4e   : > { %s2053_s21 = sld [smem:[#allocation31_spill]]  ;;  %vm577_vm13 = vcmask 1041409   ;;  %vm575_vm14 = vcmask 1040384  }
  0x4f   : > { %s348_s29 = scalar_select %p347_p11, %s1700_s26, 3 }
  0x52   : > { %p345_p1 = scmp.lt.s32.totalorder %s2051_s18, 1  ;;  %s1086_s27 = sshll.u32 %s2051_s18, 1 }
  0x53   : > { %s1708_s10 = sadd.s32 %s2052_s25, %s1086_s27  ;;  %v1259_v28 = vpop.eup %1258 }
  0x54   : > { %s2090_s18 = smov (!%p345_p1, %s2051_s18), 1  ;;  %s1711_s11 = smul.u32 12, %s1708_s10  ;;  %v487_v35 = vmul.f32 15.0, %v1259_v28  ;;  %vm491_vm4 = vweird.f32 %v1259_v28 }
  0x55   : > { %s1084_s8 = sshll.u32 %s2090_s18, 2 }
  0x56   : > { %s350_s9 = sadd.s32 %s1084_s8, %s348_s29  ;;  %s369_s12 = sadd.s32 1, %s1711_s11  ;;  %v488_v44 = vsub.f32 1.0, %v487_v35 }
  0x57   : > { %s1085_s24 = sshll.u32 %s350_s9, 2  ;;  %s1718_s7 = sld [smem:[#allocation6 + %s1711_s11]] }
  0x58   : > { %s352_s6 = scalar_lea.vmem %s2053_s21, %s1085_s24  ;;  %s370_s17 = sld [smem:[#allocation6 + %s369_s12]]  ;;  %v489_v51 = vmul.f32 %v1259_v28, %v488_v44 }
  0x59   : > { %s417_s28 = sadd.s32 8, %s1711_s11  ;;  %s395_s0 = sadd.s32 5, %s1711_s11  ;;  %v364_v0 = vld [vmem:[%s352_s6] sm:$0x77] }
  0x5a   : > { %s421_s4 = sadd.s32 9, %s1711_s11  ;;  %s418_s18 = sld [smem:[#allocation6 + %s417_s28]] }
  0x5b   : > { %s430_s25 = sadd.s32 10, %s1711_s11  ;;  %s378_s27 = sadd.s32 2, %s1711_s11 }
  0x5c   : > { %s422_s29 = sld [smem:[#allocation6 + %s421_s4]]  ;;  %s439_s5 = sadd.s32 11, %s1711_s11 }
  0x5d   : > { %s431_s8 = sld [smem:[#allocation6 + %s430_s25]]  ;;  %s391_s3 = sadd.s32 4, %s1711_s11  ;;  %v367_v14 = vstv %s1718_s7 }
  0x5e   : > { %s396_s9 = sld [smem:[#allocation6 + %s395_s0]]  ;;  %s404_s14 = sadd.s32 6, %s1711_s11  ;;  %v371_v7 = vstv %s370_s17  ;;  %v368_v22 = vmul.f32 %v367_v14, %v364_v0  ;;  %v518_v14 = vlaneseq }
  0x5f   : > { %s1727_s16 = sld [smem:[#allocation6 + %s378_s27]]  ;;  %v372_v12 = vmul.f32 %v371_v7, %v364_v0 }
  0x60   : > { %s440_s13 = sld [smem:[#allocation6 + %s439_s5]]  ;;  %v419_v1 = vstv %s418_s18 }
  0x61   : > { %s392_s24 = sld [smem:[#allocation6 + %s391_s3]]  ;;  %v420_v3 = vmul.f32 %v419_v1, %v364_v0  ;;  %s387_s3 = sadd.s32 3, %s1711_s11  ;;  %v1087_v23 = vrot.slane %v372_v12, 9 }
  0x62   : > { %s405_s12 = sld [smem:[#allocation6 + %s404_s14]]  ;;  %v423_v2 = vstv %s422_s29  ;;  %s413_s14 = sadd.s32 7, %s1711_s11 }
  0x63   : > { %v424_v4 = vmul.f32 %v423_v2, %v364_v0  ;;  %v432_v5 = vstv %s431_s8  ;;  %s1740_s5 = sld [smem:[#allocation6 + %s387_s3]]  ;;  %v377_v29 = vadd.f32 %v1087_v23, %v368_v22  ;;  %s2054_s29 = scalar_lea.vmem [#allocation8], %s1692_s1 }
  0x64   : > { %v433_v6 = vmul.f32 %v432_v5, %v364_v0  ;;  %v397_v9 = vstv %s396_s9  ;;  %s1742_s15 = sld [smem:[#allocation6 + %s413_s14]]  ;;  %s2056_s9 = smov %s2054_s29 }
  0x65   : > { %v1091_v8 = vrot.slane %v424_v4, 9  ;;  %v380_v15 = vstv %s1727_s16  ;;  %v398_v16 = vmul.f32 %v397_v9, %v364_v0  ;;  %s1738_s16 = smul.u32 9, %s1708_s10  ;;  %s2055_s8 = sld [smem:[#allocation18_spill]] }
  0x66   : > { %v1092_v10 = vrot.slane %v433_v6, 10  ;;  %v441_v13 = vstv %s440_s13  ;;  %v381_v24 = vmul.f32 %v380_v15, %v364_v0  ;;  %s1103_s13 = sshll.u32 %s1708_s10, 2 }
  0x67   : > { %v429_v11 = vadd.f32 %v1091_v8, %v420_v3  ;;  %v393_v18 = vstv %s392_s24  ;;  %v1089_v26 = vrot.slane %v398_v16, 9  ;;  %s463_s21 = sadd.s32 1, %s1738_s16  ;;  %s472_s11 = sadd.s32 3, %s1738_s16 }
  0x68   : > { %v406_v19 = vstv %s405_s12  ;;  %v394_v25 = vmul.f32 %v393_v18, %v364_v0  ;;  %v1088_v30 = vrot.slane %v381_v24, 10  ;;  %s1747_s6 = sld [smem:[#allocation2 + %s1738_s16]]  ;;  %s476_s7 = sadd.s32 4, %s1738_s16 }
  0x69   : > { %v438_v17 = vadd.f32 %v1092_v10, %v429_v11  ;;  %v407_v27 = vmul.f32 %v406_v19, %v364_v0  ;;  %s1750_s17 = sld [smem:[#allocation2 + %s463_s21]]  ;;  %s468_s0 = sadd.s32 2, %s1738_s16  ;;  %v389_v41 = vstv %s1740_s5  ;;  %v490_v0 = vadd.f32 %v1259_v28, %v489_v51 }
  0x6a   : > { %v403_v31 = vadd.f32 %v1089_v26, %v394_v25  ;;  %s1753_s28 = sld [smem:[#allocation2 + %s472_s11]]  ;;  %v386_v36 = vadd.f32 %v1088_v30, %v377_v29  ;;  %s481_s18 = sadd.s32 5, %s1738_s16  ;;  %v415_v42 = vstv %s1742_s15  ;;  %v519_v19 = vshrl.u32 %v518_v14, 7 }
  0x6b   : > { %v1733_v20 = vadd.f32 %v441_v13, %v438_v17  ;;  %v1090_v32 = vrot.slane %v407_v27, 10  ;;  %s477_s4 = sld [smem:[#allocation2 + %s476_s7]]  ;;  %v492_v5 = vsel %vm491_vm4, %v1259_v28, %v490_v0  ;;  %s1912_s24 = sand.u32 1, %s2055_s8  }
  0x6c   : > { %s469_s25 = sld [smem:[#allocation2 + %s468_s0]]  ;;  %v390_v46 = vadd.f32 %v389_v41, %v386_v36  ;;  %v520_v25 = vadd.s32 8, %v519_v19  ;;  %s1915_s12 = sadd.s32 %s1103_s13, %s1700_s26 }
  0x6d   : > { %1260 = vrcp.f32 %v1733_v20  ;;  %v412_v37 = vadd.f32 %v1090_v32, %v403_v31  ;;  %v454_v38 = vand.u32 2147483648, %v1733_v20  ;;  %vm448_vm0 = vweird.f32 %v1733_v20  ;;  %s482_s27 = sld [smem:[#allocation2 + %s481_s18]]  ;;  %s1082_s3 = sshll.u32 %s1912_s24, 2 }
  0x6e   : > { %v452_v40 = vand.u32 2147483647, %v1733_v20  ;;  %v461_v50 = vstv %s1747_s6  ;;  %v521_v32 = vcvt.s32.f32 %v519_v19  ;;  %s1108_s1 = sshll.u32 %s1915_s12, 1  ;;  %s2057_s5 = sld [smem:[#allocation34_spill]] }
  0x6f   : > { %v455_v45 = vor.u32 1.1754944e-38, %v454_v38  ;;  %v416_v47 = vadd.f32 %v415_v42, %v412_v37  ;;  %v465_v53 = vstv %s1750_s17  ;;  %s343_s26 = scalar_lea.vmem [#allocation10], %s1082_s3  ;;  %s850_s6 = scalar_lea.sflag [#allocation11], %s1912_s24 }
  0x70   : > { %vm453_vm3 = vcmp.eq.f32.partialorder %v452_v40, 8.507059e+37  ;;  %v474_v54 = vstv %s1753_s28  ;;  %s886_s10 = sshll.u32 %s343_s26, 4  ;;  %s887_s10 = int_to_ptr.vmem [resolvable:$true] %s886_s10 }
  0x71   : > { %v478_v55 = vstv %s477_s4 }
  0x72   : > { %v470_v62 = vstv %s469_s25 }
  0x73   : > { %v1261_v33 = vpop.eup %1260  ;;  %v483_v63 = vstv %s482_s27 }
  0x74   : > { %v444_v34 = vmul.f32 %v1261_v33, %v1733_v20  ;;  %vm449_vm1 = vweird.f32 %v1261_v33  ;;  %s884_s15 = scalar_lea.hbm %s2057_s5, %s1108_s1  ;;  %s1342_s4 = scalar_lea.hbm %s2057_s5, 32 }
  0x75   : > { %vm450_vm2 = vmor %vm448_vm0, %vm449_vm1  ;;  %s888_s21 = sshll.u32 %s884_s15, 4  ;;  %s889_s21 = int_to_ptr.hbm [resolvable:$true] %s888_s21 }
  0x76   : > { %v445_v39 = vsub.f32 1.0, %v444_v34  ;;  %s1336_s7 = sshra.s32 %s889_s21, 4  ;;  %s1337_s7 = int_to_ptr.hbm [resolvable:$true] %s1336_s7 }
  0x77   : > { %s1338_s17 = scalar_lea.hbm %s1337_s7, 4  ;;  %p1343_p5 = scmp.lt.s32.totalorder %s1337_s7, %s2057_s5 }
  0x78   : > { %v446_v43 = vmul.f32 %v1261_v33, %v445_v39  ;;  %p1339_p4 = scmp.ne.s32.totalorder %s1337_s7, %s1338_s17  ;;  %p1344_p7 = scmp.lt.s32.totalorder %s1342_s4, %s1338_s17 }
  0x7a   : > { %v447_v48 = vadd.f32 %v1261_v33, %v446_v43  ;;  %p1340_p2 = pnand %p1339_p4, %p1616_p6  ;;  %p1345_p8 = por %p1344_p7, %p1343_p5 }
  0x7c   : > { %v451_v49 = vsel %vm450_vm2, %v1261_v33, %v447_v48  ;;  %v522_v33 = vcvt.s32.f32 %v520_v25  ;;  %vm840_vm2 = vcmask 1041408   ;;  %p1341_p3 = pneg %p1340_p2 }
  0x7d   : > { %v456_v52 = vsel %vm453_vm3, %v455_v45, %v451_v49 }
  0x7e   : > { %v457_v56 = vmul.f32 %v456_v52, %v390_v46  ;;  %v458_v57 = vmul.f32 %v456_v52, %v416_v47  ;;  %p1346_p9 = pnand %p1345_p8, %p1341_p3 }
  0x80   : > { %v462_v58 = vmul.f32 %v461_v50, %v457_v56  ;;  %v466_v59 = vmul.f32 %v465_v53, %v458_v57  ;;  %v475_v60 = vmul.f32 %v474_v54, %v457_v56  ;;  %v479_v61 = vmul.f32 %v478_v55, %v458_v57 }
  0x82   : > { %v467_v1 = vadd.f32 %v466_v59, %v462_v58  ;;  %v480_v2 = vadd.f32 %v479_v61, %v475_v60 }
  0x84   : > { %v471_v3 = vadd.f32 %v470_v62, %v467_v1  ;;  %v484_v4 = vadd.f32 %v483_v63, %v480_v2 }
  0x86   : > { %v1093_v6 = vadd.f32 -0.5, %v471_v3  ;;  %v1095_v7 = vadd.f32 -0.5, %v484_v4 }
  0x88   : > { %v493_v8 = vmul.f32 %v1093_v6, %v492_v5  ;;  %v497_v9 = vmul.f32 %v1095_v7, %v492_v5 }
  0x8a   : > { %v494_v10 = vmul.f32 2.0, %v493_v8  ;;  %v498_v11 = vmul.f32 2.0, %v497_v9 }
  0x8c   : > { %v1765_v12 = vadd.f32 -1.0, %v494_v10  ;;  %v1767_v13 = vadd.f32 -1.0, %v498_v11 }
  0x8e   : > { %vm506_vm5 = vcmp.ne.f32.partialorder %v1765_v12, %v1765_v12  ;;  %vm508_vm6 = vcmp.ne.f32.partialorder %v1767_v13, %v1767_v13 }
  0x8f   : > { %v507_v15 = vsel %vm506_vm5, 100.0, %v1765_v12  ;;  %v509_v16 = vsel %vm508_vm6, 100.0, %v1767_v13 }
  0x90   : > { %v510_v17 = vadd.f32 1.0, %v507_v15  ;;  %v514_v18 = vadd.f32 1.0, %v509_v16 }
  0x92   : > { %v511_v21 = vmul.f32 16.0, %v510_v17  ;;  %v515_v22 = vmul.f32 16.0, %v514_v18 }
  0x94   : > { %v1097_v23 = vadd.f32 -1.0, %v511_v21  ;;  %v1098_v24 = vadd.f32 -1.0, %v515_v22 }
  0x96   : > { %v513_v26 = vmul.f32 0.5, %v1097_v23  ;;  %v517_v27 = vmul.f32 0.5, %v1098_v24 }
  0x98   : > { %v524_v28 = vperm.slane %v513_v26, 0  ;;  %v525_v29 = vperm.slane %v513_v26, 4  ;;  %v547_v30 = vperm.slane %v517_v27, 0  ;;  %v548_v31 = vperm.slane %v517_v27, 4 }
  0x9a   : > { %v528_v34 = vperm.slane %v524_v28, 0  ;;  %v529_v35 = vperm.slane %v525_v29, 0  ;;  %v551_v36 = vperm.slane %v547_v30, 0  ;;  %v552_v37 = vperm.slane %v548_v31, 0 }
  0x9c   : > { %v530_v38 = vsub.f32 %v528_v34, %v521_v32  ;;  %v531_v39 = vsub.f32 %v529_v35, %v521_v32  ;;  %v532_v40 = vsub.f32 %v528_v34, %v522_v33  ;;  %v533_v41 = vsub.f32 %v529_v35, %v522_v33 }
  0x9d   : > { %v553_v42 = vsub.f32 %v551_v36, %v521_v32  ;;  %v554_v43 = vsub.f32 %v552_v37, %v521_v32  ;;  %v555_v44 = vsub.f32 %v551_v36, %v522_v33  ;;  %v556_v45 = vsub.f32 %v552_v37, %v522_v33 }
  0x9e   : > { %v534_v46 = vand.u32 2147483647, %v530_v38  ;;  %v535_v47 = vand.u32 2147483647, %v531_v39  ;;  %v536_v48 = vand.u32 2147483647, %v532_v40 }
  0x9f   : > { %v557_v49 = vand.u32 2147483647, %v553_v42  ;;  %v558_v50 = vand.u32 2147483647, %v554_v43  ;;  %v537_v51 = vand.u32 2147483647, %v533_v41 }
  0xa0   : > { %v559_v52 = vand.u32 2147483647, %v555_v44  ;;  %v560_v55 = vand.u32 2147483647, %v556_v45  ;;  %v538_v56 = vsub.f32 1.0, %v534_v46  ;;  %v539_v57 = vsub.f32 1.0, %v535_v47 }
  0xa1   : > { %v561_v53 = vsub.f32 1.0, %v557_v49  ;;  %v562_v54 = vsub.f32 1.0, %v558_v50  ;;  %v540_v58 = vsub.f32 1.0, %v536_v48  ;;  %v541_v63 = vsub.f32 1.0, %v537_v51 }
  0xa2   : > { %v563_v59 = vsub.f32 1.0, %v559_v52  ;;  %v564_v62 = vsub.f32 1.0, %v560_v55  ;;  %v1781_v3 = vmax.f32 %v538_v56, 0.0  ;;  %v1783_v4 = vmax.f32 %v539_v57, 0.0 }
  0xa3   : > { %v1775_v60 = vmax.f32 %v561_v53, 0.0  ;;  %v566_v61 = vmax.f32 %v562_v54, 0.0  ;;  %v1785_v5 = vmax.f32 %v540_v58, 0.0  ;;  %v1798_v10 = vmax.f32 %v541_v63, 0.0 }
  0xa4   : > { %v1779_v1 = vmax.f32 %v563_v59, 0.0  ;;  %v568_v2 = vmax.f32 %v564_v62, 0.0 }
  0xa5   : > { %v1777_v0 = vrot.slane %v566_v61, 7 }
  0xa6   : > { %v1790_v7 = vrot.slane %v568_v2, 7 }
  0xa7   : > { %v596_v6 = vsel %vm595_vm7, %v1777_v0, %v1775_v60  ;;  %v593_v8 = vsel %vm592_vm8, %v1775_v60, %v1777_v0  ;;  %v590_v9 = vsel %vm589_vm9, %v1775_v60, %v1777_v0  ;;  %v1812_v19 = vsel %vm586_vm10, %v1775_v60, %v1777_v0 }
  0xa8   : > { %v597_v11 = vrot.slane %v596_v6, 7  ;;  %v594_v14 = vrot.slane %v593_v8, 6  ;;  %v591_v15 = vrot.slane %v590_v9, 5  ;;  %v611_v16 = vsel %vm595_vm7, %v1790_v7, %v1779_v1 }
  0xa9   : > { %v609_v17 = vsel %vm592_vm8, %v1779_v1, %v1790_v7  ;;  %v607_v18 = vsel %vm589_vm9, %v1779_v1, %v1790_v7  ;;  %v612_v22 = vrot.slane %v611_v16, 7  ;;  %v588_v35 = vrot.slane %v1812_v19, 4 }
  0xaa   : > { %v628_v21 = vperm.slane %v597_v11, 1  ;;  %v626_v23 = vperm.slane %v594_v14, 1  ;;  %v610_v24 = vrot.slane %v609_v17, 6  ;;  %v627_v25 = vperm.slane %v597_v11, 0 }
  0xab   : > { %v624_v26 = vperm.slane %v591_v15, 1  ;;  %v608_v27 = vrot.slane %v607_v18, 5  ;;  %v644_v29 = vperm.slane %v612_v22, 1  ;;  %v625_v31 = vperm.slane %v594_v14, 0 }
  0xac   : > { %v708_v28 = vmul.f32 %v628_v21, %v1798_v10  ;;  %v706_v30 = vmul.f32 %v628_v21, %v1783_v4  ;;  %v642_v32 = vperm.slane %v610_v24, 1  ;;  %v707_v33 = vmul.f32 %v627_v25, %v1785_v5 }
  0xad   : > { %v643_v34 = vperm.slane %v612_v22, 0  ;;  %v740_v36 = vmul.f32 %v644_v29, %v1798_v10  ;;  %v738_v37 = vmul.f32 %v644_v29, %v1783_v4  ;;  %v704_v38 = vmul.f32 %v626_v23, %v1798_v10 }
  0xae   : > { %783 = vmatpush.msra.mxu2 %v708_v28  ;;  %v705_v39 = vmul.f32 %v627_v25, %v1781_v3  ;;  %743 = vmatpush.msra.mxu0 %v707_v33  ;;  %v702_v41 = vmul.f32 %v626_v23, %v1783_v4  ;;  %v700_v43 = vmul.f32 %v624_v26, %v1798_v10  ;;  %v640_v45 = vperm.slane %v608_v27, 1 }
  0xaf   : > { %v739_v40 = vmul.f32 %v643_v34, %v1785_v5  ;;  %v737_v42 = vmul.f32 %v643_v34, %v1781_v3  ;;  %803 = vmatpush.msra.mxu3 %v740_v36  ;;  %v736_v44 = vmul.f32 %v642_v32, %v1798_v10  ;;  %v703_v46 = vmul.f32 %v625_v31, %v1785_v5 }
  0xb0   : > { %784 = vmatpush.msra.mxu2 %v706_v30  ;;  %v641_v47 = vperm.slane %v610_v24, 0  ;;  %744 = vmatpush.msra.mxu0 %v705_v39  ;;  %v701_v48 = vmul.f32 %v625_v31, %v1781_v3  ;;  %v622_v49 = vperm.slane %v588_v35, 1  ;;  %v605_v50 = vsel %vm586_vm10, %v1779_v1, %v1790_v7 }
  0xb1   : > { %763 = vmatpush.msra.mxu1 %v739_v40  ;;  %v623_v51 = vperm.slane %v591_v15, 0  ;;  %804 = vmatpush.msra.mxu3 %v738_v37  ;;  %v734_v52 = vmul.f32 %v642_v32, %v1783_v4  ;;  %v698_v54 = vmul.f32 %v624_v26, %v1783_v4  ;;  %v606_v55 = vrot.slane %v605_v50, 4 }
  0xb2   : > { %785 = vmatpush.msra.mxu2 %v704_v38  ;;  %v735_v53 = vmul.f32 %v641_v47, %v1785_v5  ;;  %v732_v56 = vmul.f32 %v640_v45, %v1798_v10  ;;  %745 = vmatpush.msra.mxu0 %v703_v46  ;;  %v733_v57 = vmul.f32 %v641_v47, %v1781_v3  ;;  %v639_v59 = vperm.slane %v608_v27, 0 }
  0xb3   : > { %764 = vmatpush.msra.mxu1 %v737_v42  ;;  %v699_v58 = vmul.f32 %v623_v51, %v1785_v5  ;;  %805 = vmatpush.msra.mxu3 %v736_v44  ;;  %v730_v61 = vmul.f32 %v640_v45, %v1783_v4  ;;  %v696_v62 = vmul.f32 %v622_v49, %v1798_v10  ;;  %v638_v63 = vperm.slane %v606_v55, 1 }
  0xb4   : > { %786 = vmatpush.msra.mxu2 %v702_v41  ;;  %v584_v2 = vsel %vm583_vm11, %v1775_v60, %v1777_v0  ;;  %746 = vmatpush.msra.mxu0 %v701_v48  ;;  %v731_v6 = vmul.f32 %v639_v59, %v1785_v5  ;;  %v697_v8 = vmul.f32 %v623_v51, %v1781_v3  ;;  %v621_v17 = vperm.slane %v588_v35, 0 }
  0xb5   : > { %765 = vmatpush.msra.mxu1 %v735_v53  ;;  %v585_v9 = vrot.slane %v584_v2, 3  ;;  %v603_v11 = vsel %vm583_vm11, %v1779_v1, %v1790_v7  ;;  %806 = vmatpush.msra.mxu3 %v734_v52  ;;  %v694_v14 = vmul.f32 %v622_v49, %v1783_v4  ;;  %v729_v15 = vmul.f32 %v639_v59, %v1781_v3 }
  0xb6   : > { %787 = vmatpush.msra.mxu2 %v700_v43  ;;  %v604_v16 = vrot.slane %v603_v11, 3  ;;  %747 = vmatpush.msra.mxu0 %v699_v58  ;;  %v637_v19 = vperm.slane %v606_v55, 0  ;;  %v581_v21 = vsel %vm580_vm12, %v1775_v60, %v1777_v0  ;;  %v601_v22 = vsel %vm580_vm12, %v1779_v1, %v1790_v7 }
  0xb7   : > { %766 = vmatpush.msra.mxu1 %v733_v57  ;;  %v620_v18 = vperm.slane %v585_v9, 1  ;;  %807 = vmatpush.msra.mxu3 %v732_v56  ;;  %v728_v23 = vmul.f32 %v638_v63, %v1798_v10  ;;  %v695_v25 = vmul.f32 %v621_v17, %v1785_v5  ;;  %v582_v26 = vrot.slane %v581_v21, 2 }
  0xb8   : > { %788 = vmatpush.msra.mxu2 %v698_v54  ;;  %v636_v24 = vperm.slane %v604_v16, 1  ;;  %748 = vmatpush.msra.mxu0 %v697_v8  ;;  %v727_v27 = vmul.f32 %v637_v19, %v1785_v5  ;;  %v693_v28 = vmul.f32 %v621_v17, %v1781_v3  ;;  %v602_v29 = vrot.slane %v601_v22, 2 }
  0xb9   : > { %767 = vmatpush.msra.mxu1 %v731_v6  ;;  %808 = vmatpush.msra.mxu3 %v730_v61  ;;  %v726_v30 = vmul.f32 %v638_v63, %v1783_v4  ;;  %v692_v31 = vmul.f32 %v620_v18, %v1798_v10  ;;  %v690_v32 = vmul.f32 %v620_v18, %v1783_v4  ;;  %v618_v33 = vperm.slane %v582_v26, 1 }
  0xba   : > { %789 = vmatpush.msra.mxu2 %v696_v62  ;;  %749 = vmatpush.msra.mxu0 %v695_v25  ;;  %v725_v34 = vmul.f32 %v637_v19, %v1781_v3  ;;  %v619_v35 = vperm.slane %v585_v9, 0  ;;  %v635_v36 = vperm.slane %v604_v16, 0  ;;  %v578_v37 = vsel %vm577_vm13, %v1775_v60, %v1777_v0  ;;  %v741_v25 = vld [vmem:[%s2054_s29] sm:$0xff] }
  0xbb   : > { %768 = vmatpush.msra.mxu1 %v729_v15  ;;  %809 = vmatpush.msra.mxu3 %v728_v23  ;;  %v724_v38 = vmul.f32 %v636_v24, %v1798_v10  ;;  %v634_v39 = vperm.slane %v602_v29, 1  ;;  %v579_v40 = vrot.slane %v578_v37, 1  ;;  %v599_v41 = vsel %vm577_vm13, %v1779_v1, %v1790_v7 }
  0xbc   : > { %790 = vmatpush.msra.mxu2 %v694_v14  ;;  %750 = vmatpush.msra.mxu0 %v693_v28  ;;  %v691_v42 = vmul.f32 %v619_v35, %v1785_v5  ;;  %v723_v43 = vmul.f32 %v635_v36, %v1785_v5  ;;  %v600_v44 = vrot.slane %v599_v41, 1  ;;  %v722_v45 = vmul.f32 %v636_v24, %v1783_v4 }
  0xbd   : > { %769 = vmatpush.msra.mxu1 %v727_v27  ;;  %810 = vmatpush.msra.mxu3 %v726_v30  ;;  %v688_v46 = vmul.f32 %v618_v33, %v1798_v10  ;;  %v689_v47 = vmul.f32 %v619_v35, %v1781_v3  ;;  %v616_v48 = vperm.slane %v579_v40, 1  ;;  %v721_v49 = vmul.f32 %v635_v36, %v1781_v3  ;;  %v742_v27 = vld [vmem:[%s2056_s9 + $0x8] sm:$0xff] }
  0xbe   : > { %791 = vmatpush.msra.mxu2 %v692_v31  ;;  %751 = vmatpush.msra.mxu0 %v691_v42  ;;  %v617_v50 = vperm.slane %v582_v26, 0  ;;  %v633_v51 = vperm.slane %v602_v29, 0  ;;  %v576_v52 = vsel %vm575_vm14, %v1775_v60, %v1777_v0  ;;  %v720_v53 = vmul.f32 %v634_v39, %v1798_v10 }
  0xbf   : > { %770 = vmatpush.msra.mxu1 %v725_v34  ;;  %811 = vmatpush.msra.mxu3 %v724_v38  ;;  %v686_v54 = vmul.f32 %v618_v33, %v1783_v4  ;;  %v718_v55 = vmul.f32 %v634_v39, %v1783_v4  ;;  %v632_v56 = vperm.slane %v600_v44, 1  ;;  %v598_v59 = vsel %vm575_vm14, %v1779_v1, %v1790_v7 }
  0xc0   : > { %792 = vmatpush.msra.mxu2 %v690_v32  ;;  %752 = vmatpush.msra.mxu0 %v689_v47  ;;  %v687_v57 = vmul.f32 %v617_v50, %v1785_v5  ;;  %v719_v58 = vmul.f32 %v633_v51, %v1785_v5  ;;  %v684_v60 = vmul.f32 %v616_v48, %v1798_v10  ;;  %v614_v61 = vperm.slane %v576_v52, 1 }
  0xc1   : > { %771 = vmatpush.msra.mxu1 %v723_v43  ;;  %812 = vmatpush.msra.mxu3 %v722_v45  ;;  %v685_v0 = vmul.f32 %v617_v50, %v1781_v3  ;;  %v615_v62 = vperm.slane %v579_v40, 0  ;;  %v682_v63 = vmul.f32 %v616_v48, %v1783_v4  ;;  %v717_v2 = vmul.f32 %v633_v51, %v1781_v3 }
  0xc2   : > { %793 = vmatpush.msra.mxu2 %v688_v46  ;;  %753 = vmatpush.msra.mxu0 %v687_v57  ;;  %v631_v6 = vperm.slane %v600_v44, 0  ;;  %v716_v8 = vmul.f32 %v632_v56, %v1798_v10  ;;  %v630_v1 = vperm.slane %v598_v59, 1  ;;  %v613_v9 = vperm.slane %v576_v52, 0 }
  0xc3   : > { %772 = vmatpush.msra.mxu1 %v721_v49  ;;  %813 = vmatpush.msra.mxu3 %v720_v53  ;;  %v683_v7 = vmul.f32 %v615_v62, %v1785_v5  ;;  %v681_v14 = vmul.f32 %v615_v62, %v1781_v3  ;;  %v629_v15 = vperm.slane %v598_v59, 0  ;;  %v714_v16 = vmul.f32 %v632_v56, %v1783_v4 }
  0xc4   : > { %794 = vmatpush.msra.mxu2 %v686_v54  ;;  %754 = vmatpush.msra.mxu0 %v685_v0  ;;  %v715_v11 = vmul.f32 %v631_v6, %v1785_v5  ;;  %v680_v17 = vmul.f32 %v614_v61, %v1798_v10  ;;  %v713_v18 = vmul.f32 %v631_v6, %v1781_v3  ;;  %v832_v30 = vperm.slane %v1733_v20, 4 }
  0xc5   : > { %773 = vmatpush.msra.mxu1 %v719_v58  ;;  %814 = vmatpush.msra.mxu3 %v718_v55  ;;  %v679_v19 = vmul.f32 %v613_v9, %v1785_v5  ;;  %v712_v21 = vmul.f32 %v630_v1, %v1798_v10  ;;  %v678_v22 = vmul.f32 %v614_v61, %v1783_v4 }
  0xc6   : > { %795 = vmatpush.msra.mxu2 %v684_v60  ;;  %755 = vmatpush.msra.mxu0 %v683_v7  ;;  %v711_v23 = vmul.f32 %v629_v15, %v1785_v5  ;;  %v710_v24 = vmul.f32 %v630_v1, %v1783_v4  ;;  %v677_v26 = vmul.f32 %v613_v9, %v1781_v3  ;;  %v502_v4 = vand.u32 2147483647, %v1767_v13 }
  0xc7   : > { %774 = vmatpush.msra.mxu1 %v717_v2  ;;  %815 = vmatpush.msra.mxu3 %v716_v8  ;;  %v709_v10 = vmul.f32 %v629_v15, %v1781_v3  ;;  %v500_v3 = vand.u32 2147483647, %v1765_v12  ;;  %v1505_v5 = vmov 0.0   ;;  %v831_v13 = vperm.slane %v1733_v20, 0 }
  0xc8   : > { %796 = vmatpush.msra.mxu2 %v682_v63  ;;  %756 = vmatpush.msra.mxu0 %v681_v14  ;;  %vm503_vm0 = vcmp.lt.f32.partialorder %v502_v4, 1.00001 }
  0xc9   : > { %775 = vmatpush.msra.mxu1 %v715_v11  ;;  %816 = vmatpush.msra.mxu3 %v714_v16  ;;  %vm501_vm15 = vcmp.lt.f32.partialorder %v500_v3, 1.00001 }
  0xca   : > { %797 = vmatpush.msra.mxu2 %v680_v17  ;;  %757 = vmatpush.msra.mxu0 %v679_v19  ;;  %vm504_vm1 = vmand %vm501_vm15, %vm503_vm0 }
  0xcb   : > { %776 = vmatpush.msra.mxu1 %v713_v18  ;;  %817 = vmatpush.msra.mxu3 %v712_v21  ;;  %v505_v28 = vsel %vm504_vm1, 1.0, %v1505_v5 }
  0xcc   : > { %798 = vmatpush.msra.mxu2 %v678_v22  ;;  %758 = vmatpush.msra.mxu0 %v677_v26  ;;  %v827_v29 = vperm.slane %v505_v28, 4  ;;  %v826_v12 = vperm.slane %v505_v28, 0 }
  0xcd   : > { %799 = vmatmul.f32.vlgmr.msra.gmra.mxu2 %v741_v25  ;;  %777 = vmatpush.msra.mxu1 %v711_v23 }
  0xce   : > { %818 = vmatpush.msra.mxu3 %v710_v24  ;;  %759 = vmatmul.f32.vlgmr.msra.gmra.mxu0 %v741_v25  ;;  %v836_v31 = vsel %vm575_vm14, %v827_v29, %v832_v30  ;;  %v835_v33 = vsel %vm575_vm14, %v826_v12, %v831_v13 }
  0xcf   : > { %819 = vmatmul.f32.vlgmr.msra.gmra.mxu3 %v742_v27  ;;  %778 = vmatpush.msra.mxu1 %v709_v10  ;;  %v839_v32 = vrot.slane %v836_v31, 6 }
  0xd0   : > { %779 = vmatmul.f32.vlgmr.msra.gmra.mxu1 %v742_v27 }
  0xd1   : > { %v841_v34 = vsel %vm840_vm2, %v835_v33, %v839_v32 }
  0xd2   : > { %843 = vst [vmem:[%s343_s26] sm:$0xf] %v841_v34 }
  0xd3   : > { %1349 = shalt.err (!%p1346_p9)
}
  0xd4   : > { %1123 = dma.vmem_to_hbm [thread:$0]  (%p1616_p6), %s887_s10, 64, %s889_s21, %s850_s6  }
  0xd5   : > { %s1081_s27 = sshll.u32 %s1912_s24, 4  ;;  %s1104_s29 = sshll.u32 %s1915_s12, 3 }
  0xd6   : > { %s2059_s13 = sld [smem:[#allocation33_spill]]  ;;  %s336_s1 = scalar_lea.vmem [#allocation9], %s1081_s27 }
  0xd7   : > { %s867_s14 = sshll.u32 %s336_s1, 4  ;;  %s845_s15 = scalar_lea.sflag [#allocation4], %s1912_s24  ;;  %s868_s14 = int_to_ptr.vmem [resolvable:$true] %s867_s14 }
  0xdc   : > { %s865_s3 = scalar_lea.hbm %s2059_s13, %s1104_s29  ;;  %s1370_s6 = scalar_lea.hbm %s2059_s13, 128 }
  0xdd   : > { %s869_s16 = sshll.u32 %s865_s3, 4  ;;  %s870_s16 = int_to_ptr.hbm [resolvable:$true] %s869_s16 }
  0xde   : > { %s1364_s12 = sshra.s32 %s870_s16, 4  ;;  %s1365_s12 = int_to_ptr.hbm [resolvable:$true] %s1364_s12 }
  0xdf   : > { %s1366_s26 = scalar_lea.hbm %s1365_s12, 16  ;;  %p1371_p1 = scmp.lt.s32.totalorder %s1365_s12, %s2059_s13 }
  0xe0   : > { %p1367_p12 = scmp.ne.s32.totalorder %s1365_s12, %s1366_s26  ;;  %p1372_p11 = scmp.lt.s32.totalorder %s1370_s6, %s1366_s26 }
  0xe2   : > { %p1368_p13 = pnand %p1367_p12, %p1616_p6  ;;  %p1373_p4 = por %p1372_p11, %p1371_p1 }
  0xe4   : > { %p1369_p0 = pneg %p1368_p13 }
  0xe6   : > { %p1374_p2 = pnand %p1373_p4, %p1369_p0 }
 0x14b   : > { %v760_v20 = vpop.f32.mrf.mxu0 }
 0x14d   : > { %v780_v35 = vpop.f32.mrf.mxu1 }
 0x14e   : > { %v781_v36 = vadd.f32 %v780_v35, %v760_v20 }
 0x150   : > { %823 = vst [vmem:[%s336_s1] sm:$0xff] %v781_v36  ;;  %v800_v37 = vpop.f32.mrf.mxu2 }
 0x152   : > { %v820_v38 = vpop.f32.mrf.mxu3 }
 0x153   : > { %v821_v39 = vadd.f32 %v820_v38, %v800_v37 }
 0x155   : > { %824 = vst [vmem:[%s336_s1 + $0x8] sm:$0xff] %v821_v39 }
 0x156   : > { %1377 = shalt.err (!%p1374_p2)
}
 0x157   : > { %1122 = dma.vmem_to_hbm [thread:$0]  (%p1616_p6), %s868_s14, 256, %s870_s16, %s845_s15  }
 0x158 PF: > { %s2060_s24 = sld [smem:[#allocation17_spill]]  ;;  %p1149_p3 = scmp.ge.s32.totalorder %s1500_s30, 2 }
 0x15a   : > { %p1138_p5 = pnand %p1149_p3, %p1622_p10 }
 0x15c   : > { %p1139_p7 = pneg %p1138_p5 }
 0x15e   : > { %s900_s0 = sand.u32 1, %s2060_s24  }
 0x15f   : > { %s901_s4 = scalar_lea.sflag [#allocation4], %s900_s0 }
 0x160   : > { %1443 = dma.done.wait (%p1139_p7), %s901_s4, 256  }
 0x161   : > { %1445 = vsyncadd (%p1139_p7), %s901_s4, 4294967040  ;;  %s911_s18 = scalar_lea.sflag [#allocation11], %s900_s0 }
 0x162   : > { %1447 = dma.done.wait (%p1139_p7), %s911_s18, 64  }
 0x163   : > { %1449 = vsyncadd (%p1139_p7), %s911_s18, 4294967232  ;;  %s27_s30 = sadd.s32 1, %s1500_s30   ;;  %s2063_s18 = sld [smem:[#allocation18_spill]] }
 0x164   : > { %p1960_p8 = scmp.ge.s32.totalorder %s27_s30, 10   ;;  %s2064_s25 = smov %s1672_s19 }
 0x165   : > { %s2065_s24 = sld [smem:[#allocation21_spill]]  ;;  %s2071_s19 = smov %s1460_s20 }
 0x166   : > { %s2066_s27 = sld [smem:[#allocation22_spill]]  ;;  %s2072_s20 = smov %s1675_s2 }
 0x167   : > { %s2067_s26 = sld [smem:[#allocation23_spill]]  ;;  %s2073_s21 = smov %s1468_s22 }
 0x168   : > { %s2068_s29 = sld [smem:[#allocation26_spill]]  ;;  %s2074_s22 = smov %s1472_s23 }
 0x169   : > { %s2069_s28 = sld [smem:[#allocation27_spill]]  ;;  %s2075_s23 = smov %s2064_s25 }
 0x16a   : > { %s2070_s8 = sld [smem:[#allocation28_spill]] }
 0x16c   : > { %s2076_s25 = smov %s2066_s27  ;;  %26 = sbr.rel (!%p1960_p8) target bundleno = 21 (0x15), region = 110 }
 0x16e   : > { %s2077_s27 = smov %s2068_s29 }
 0x170   : > { %s2078_s29 = smov %s2070_s8 }
 0x171   :  { %917 = vsyncpa [#allocation3], 1 }
 0x172   :  { %919 = vsyncpa [#allocation3 + $0x1], 1 }
 0x173   :  { %920 = vsyncpa [#allocation4], 1 }
 0x174   :  { %922 = vsyncpa [#allocation4 + $0x1], 1 }
 0x175   :  { %923 = vsyncpa [#allocation11], 1 }
 0x176   :  { %925 = vsyncpa [#allocation11 + $0x1], 1 }
 0x177   :  { %926 = vsyncpa [#allocation5], 1 }
 0x178   :  { %928 = vsyncpa [#allocation5 + $0x1], 1 }
 0x179   :  { %929 = vsyncpa [#allocation7], 1 }

</bundles_post_ra>
